<compile_context>
chip_gen: v7x
topology: tpu7x:2x2x1
jax: 0.10.0
libtpu: 0.0.40
codegen_flags: <defaults>
</compile_context>

<pallas_src>
import math

import jax
import jax.numpy as jnp
from jax import lax
from jax.experimental import pallas as pl
from jax.experimental.pallas import tpu as pltpu


# ---------------------------------------------------------------------------
# Parameter slab layout (rows x 128 lanes, f32). All section starts 8-aligned.
#   rows   0.. 12 : w1  (13, 32)   lanes 0..31
#   rows  16.. 47 : w2  (32, 32)   lanes 0..31
#   rows  48.. 79 : w3  (32, 32)   lanes 0..31
#   rows  80..111 : w4  (32,  3)   lanes 0..2
#   row   112     : b1  (32,)      lanes 0..31
#   row   120     : b2  (32,)      lanes 0..31
#   row   128     : b3  (32,)      lanes 0..31
#   row   136     : b4  ( 3,)      lanes 0..2
# ---------------------------------------------------------------------------
SLAB_ROWS = 144
NUM_CLASSES = 3
IN_FEATURES = 13
HIDDEN = 32


def mynet_kernel(x_ref, p_ref, o_ref):
    x = x_ref[...]                                  # (TB, 13) f32

    # Zero-cost static views into the packed parameter slab.
    w1 = p_ref[0:13, 0:32]                          # (13, 32)
    w2 = p_ref[16:48, 0:32]                         # (32, 32)
    w3 = p_ref[48:80, 0:32]                         # (32, 32)
    w4 = p_ref[80:112, :]                           # (32, 128), lanes 3..127 zero
    b1 = p_ref[112:113, 0:32]                       # (1, 32)
    b2 = p_ref[120:121, 0:32]                       # (1, 32)
    b3 = p_ref[128:129, 0:32]                       # (1, 32)
    b4 = p_ref[136:137, :]                          # (1, 128), lanes 3..127 zero

    h1 = jnp.maximum(
        jnp.dot(x, w1, preferred_element_type=jnp.float32) + b1, 0.0)
    h2 = jnp.maximum(
        jnp.dot(h1, w2, preferred_element_type=jnp.float32) + b2, 0.0)
    h3 = jnp.maximum(
        jnp.dot(h2, w3, preferred_element_type=jnp.float32) + b3, 0.0)
    logits = (jnp.dot(h3, w4, preferred_element_type=jnp.float32)
              + b4)                                 # (TB, 128)

    # Explicitly mask the padded lanes so they cannot leak into the
    # log_softmax reductions (PyTorch dim=1 over the 3 real classes).
    lane = lax.broadcasted_iota(jnp.int32, logits.shape, 1)
    logits = jnp.where(lane < NUM_CLASSES, logits, -1e30)

    m = jnp.max(logits, axis=-1, keepdims=True)
    shifted = logits - m
    lse = jnp.log(jnp.sum(jnp.exp(shifted), axis=-1, keepdims=True))
    o_ref[...] = shifted - lse                      # lanes 0..2 valid, rest junk


def _round_up(n, m):
    return ((n + m - 1) // m) * m


def mynet_forward(x, slab, block_b=2048):
    """x: (B, 13) f32. slab: (SLAB_ROWS, 128) packed params. Returns (B, 3)."""
    B, F = x.shape
    assert F == IN_FEATURES
    tb = min(block_b, _round_up(B, 8))      # small batches use one small tile
    Bp = _round_up(B, tb)
    if Bp != B:
        x = jnp.pad(x, ((0, Bp - B), (0, 0)))

    out = pl.pallas_call(
        mynet_kernel,
        out_shape=jax.ShapeDtypeStruct((Bp, 128), jnp.float32),
        grid=(Bp // tb,),
        in_specs=[
            pl.BlockSpec((tb, F), lambda i: (i, 0)),            # batch tile
            pl.BlockSpec((SLAB_ROWS, 128), lambda i: (0, 0)),   # resident slab
        ],
        out_specs=pl.BlockSpec((tb, 128), lambda i: (i, 0)),    # lane-dense
        compiler_params=pltpu.CompilerParams(
            dimension_semantics=("parallel",)),                 # 2 TCs on v7x
    )(x, slab)
    return out[:B, :NUM_CLASSES]


def init_params(key):
    """nn.Linear-style init: U(-1/sqrt(fan_in), +1/sqrt(fan_in)).
    Weights stored transposed as (in, out); biases as (1, out)."""
    dims = [(IN_FEATURES, HIDDEN), (HIDDEN, HIDDEN),
            (HIDDEN, HIDDEN), (HIDDEN, NUM_CLASSES)]
    params = {}
    keys = jax.random.split(key, 2 * len(dims))
    for i, (fan_in, fan_out) in enumerate(dims):
        bound = 1.0 / math.sqrt(fan_in)
        params[f"w{i + 1}"] = jax.random.uniform(
            keys[2 * i], (fan_in, fan_out),
            minval=-bound, maxval=bound, dtype=jnp.float32)
        params[f"b{i + 1}"] = jax.random.uniform(
            keys[2 * i + 1], (1, fan_out),
            minval=-bound, maxval=bound, dtype=jnp.float32)
    return params


def pack_params(params):
    """Pack all weights/biases into one 8-row-aligned (SLAB_ROWS, 128) slab."""
    slab = jnp.zeros((SLAB_ROWS, 128), jnp.float32)
    slab = slab.at[0:13, 0:32].set(params["w1"])
    slab = slab.at[16:48, 0:32].set(params["w2"])
    slab = slab.at[48:80, 0:32].set(params["w3"])
    slab = slab.at[80:112, 0:3].set(params["w4"])
    slab = slab.at[112, 0:32].set(params["b1"].reshape(HIDDEN))
    slab = slab.at[120, 0:32].set(params["b2"].reshape(HIDDEN))
    slab = slab.at[128, 0:32].set(params["b3"].reshape(HIDDEN))
    slab = slab.at[136, 0:3].set(params["b4"].reshape(NUM_CLASSES))
    return slab


def _reference_forward(x, p):
    h = jnp.maximum(x @ p["w1"] + p["b1"], 0.0)
    h = jnp.maximum(h @ p["w2"] + p["b2"], 0.0)
    h = jnp.maximum(h @ p["w3"] + p["b3"], 0.0)
    z = h @ p["w4"] + p["b4"]
    return jax.nn.log_softmax(z, axis=-1)


if __name__ == "__main__":
    key = jax.random.PRNGKey(0)
    pkey, xkey = jax.random.split(key)
    params = init_params(pkey)
    slab = pack_params(params)

    # Wine-dataset-style input: batch of 8 samples, 13 features.
    x = jax.random.normal(xkey, (8, 13), dtype=jnp.float32)

    out = mynet_forward(x, slab)
    out = jax.block_until_ready(out)

    # Sanity checks: shape, rows exp-sum to 1, matches pure-JAX reference.
    ref = _reference_forward(x, params)
    row_sums = jnp.sum(jnp.exp(out), axis=-1)
    assert out.shape == (8, 3)
    assert bool(jnp.all(jnp.abs(row_sums - 1.0) < 1e-5))
    assert bool(jnp.max(jnp.abs(out - ref)) < 1e-4)

    print("KERNEL_OK")
</pallas_src>

<mosaic_0001>
module attributes {stable_mosaic.version = 11 : i64} {
  func.func @mynet_kernel(%arg0: i32, %arg1: memref<8x13xf32, #tpu.memory_space<vmem>>, %arg2: memref<144x128xf32, #tpu.memory_space<vmem>>, %arg3: memref<8x128xf32, #tpu.memory_space<vmem>>) attributes {dimension_semantics = [#tpu.dimension_semantics<parallel>], iteration_bounds = array<i64: 1>, scalar_prefetch = 0 : i64, scratch_operands = 0 : i64, tpu.core_type = #tpu.core_type<tc>, window_params = [{transform_indices = @transform_0, window_bounds = array<i64: 8, 13>}, {pipeline_mode = #tpu.pipeline_mode<synchronous>, transform_indices = @transform_1, window_bounds = array<i64: 144, 128>}, {transform_indices = @transform_2, window_bounds = array<i64: 8, 128>}]} {
    %c0 = arith.constant 0 : index
    %c0_0 = arith.constant 0 : index
    %0 = vector.load %arg1[%c0, %c0_0] : memref<8x13xf32, #tpu.memory_space<vmem>>, vector<8x13xf32>
    %c0_1 = arith.constant 0 : index
    %c0_2 = arith.constant 0 : index
    %1 = vector.load %arg2[%c0_1, %c0_2] : memref<144x128xf32, #tpu.memory_space<vmem>>, vector<13x32xf32>
    %c16 = arith.constant 16 : index
    %c0_3 = arith.constant 0 : index
    %2 = vector.load %arg2[%c16, %c0_3] : memref<144x128xf32, #tpu.memory_space<vmem>>, vector<32x32xf32>
    %c48 = arith.constant 48 : index
    %c0_4 = arith.constant 0 : index
    %3 = vector.load %arg2[%c48, %c0_4] : memref<144x128xf32, #tpu.memory_space<vmem>>, vector<32x32xf32>
    %c80 = arith.constant 80 : index
    %c0_5 = arith.constant 0 : index
    %4 = vector.load %arg2[%c80, %c0_5] : memref<144x128xf32, #tpu.memory_space<vmem>>, vector<32x128xf32>
    %c112 = arith.constant 112 : index
    %c0_6 = arith.constant 0 : index
    %5 = vector.load %arg2[%c112, %c0_6] : memref<144x128xf32, #tpu.memory_space<vmem>>, vector<1x32xf32>
    %c120 = arith.constant 120 : index
    %c0_7 = arith.constant 0 : index
    %6 = vector.load %arg2[%c120, %c0_7] : memref<144x128xf32, #tpu.memory_space<vmem>>, vector<1x32xf32>
    %c128 = arith.constant 128 : index
    %c0_8 = arith.constant 0 : index
    %7 = vector.load %arg2[%c128, %c0_8] : memref<144x128xf32, #tpu.memory_space<vmem>>, vector<1x32xf32>
    %c136 = arith.constant 136 : index
    %c0_9 = arith.constant 0 : index
    %8 = vector.load %arg2[%c136, %c0_9] : memref<144x128xf32, #tpu.memory_space<vmem>>, vector<1x128xf32>
    %cst = arith.constant dense<0.000000e+00> : vector<8x32xf32>
    %9 = tpu.matmul %0, %1, %cst {dimension_numbers = #tpu.dot_dimension_numbers<[1], [0], [0], [1], [0, 0, 1, 1], [], []>} : vector<8x13xf32>, vector<13x32xf32>, vector<8x32xf32> -> vector<8x32xf32>
    %10 = vector.broadcast %5 : vector<1x32xf32> to vector<8x32xf32>
    %11 = arith.addf %9, %10 : vector<8x32xf32>
    %cst_10 = arith.constant 0.000000e+00 : f32
    %12 = vector.broadcast %cst_10 : f32 to vector<8x32xf32>
    %13 = arith.maximumf %11, %12 : vector<8x32xf32>
    %cst_11 = arith.constant dense<0.000000e+00> : vector<8x32xf32>
    %14 = tpu.matmul %13, %2, %cst_11 {dimension_numbers = #tpu.dot_dimension_numbers<[1], [0], [0], [1], [0, 0, 1, 1], [], []>} : vector<8x32xf32>, vector<32x32xf32>, vector<8x32xf32> -> vector<8x32xf32>
    %15 = vector.broadcast %6 : vector<1x32xf32> to vector<8x32xf32>
    %16 = arith.addf %14, %15 : vector<8x32xf32>
    %cst_12 = arith.constant 0.000000e+00 : f32
    %17 = vector.broadcast %cst_12 : f32 to vector<8x32xf32>
    %18 = arith.maximumf %16, %17 : vector<8x32xf32>
    %cst_13 = arith.constant dense<0.000000e+00> : vector<8x32xf32>
    %19 = tpu.matmul %18, %3, %cst_13 {dimension_numbers = #tpu.dot_dimension_numbers<[1], [0], [0], [1], [0, 0, 1, 1], [], []>} : vector<8x32xf32>, vector<32x32xf32>, vector<8x32xf32> -> vector<8x32xf32>
    %20 = vector.broadcast %7 : vector<1x32xf32> to vector<8x32xf32>
    %21 = arith.addf %19, %20 : vector<8x32xf32>
    %cst_14 = arith.constant 0.000000e+00 : f32
    %22 = vector.broadcast %cst_14 : f32 to vector<8x32xf32>
    %23 = arith.maximumf %21, %22 : vector<8x32xf32>
    %cst_15 = arith.constant dense<0.000000e+00> : vector<8x128xf32>
    %24 = tpu.matmul %23, %4, %cst_15 {dimension_numbers = #tpu.dot_dimension_numbers<[1], [0], [0], [1], [0, 0, 1, 1], [], []>} : vector<8x32xf32>, vector<32x128xf32>, vector<8x128xf32> -> vector<8x128xf32>
    %25 = vector.broadcast %8 : vector<1x128xf32> to vector<8x128xf32>
    %26 = arith.addf %24, %25 : vector<8x128xf32>
    %27 = tpu.iota {dimensions = array<i32: 1>} : vector<8x128xi32>
    %c3_i32 = arith.constant 3 : i32
    %28 = vector.broadcast %c3_i32 : i32 to vector<8x128xi32>
    %29 = arith.cmpi slt, %27, %28 : vector<8x128xi32>
    %cst_16 = arith.constant -1.000000e+30 : f32
    %30 = vector.broadcast %cst_16 : f32 to vector<8x128xf32>
    %31 = arith.select %29, %26, %30 : vector<8x128xi1>, vector<8x128xf32>
    %cst_17 = arith.constant dense<0xFF800000> : vector<8xf32>
    %32 = vector.multi_reduction <maximumf>, %31, %cst_17 [1] : vector<8x128xf32> to vector<8xf32>
    %33 = vector.shape_cast %32 : vector<8xf32> to vector<8x1xf32>
    %34 = vector.broadcast %33 : vector<8x1xf32> to vector<8x128xf32>
    %35 = arith.subf %31, %34 : vector<8x128xf32>
    %36 = math.exp %35 : vector<8x128xf32>
    %cst_18 = arith.constant dense<0.000000e+00> : vector<8xf32>
    %37 = vector.multi_reduction <add>, %36, %cst_18 [1] : vector<8x128xf32> to vector<8xf32>
    %38 = vector.shape_cast %37 : vector<8xf32> to vector<8x1xf32>
    %39 = math.log %38 : vector<8x1xf32>
    %40 = vector.broadcast %39 : vector<8x1xf32> to vector<8x128xf32>
    %41 = arith.subf %35, %40 : vector<8x128xf32>
    %c0_19 = arith.constant 0 : index
    %c0_20 = arith.constant 0 : index
    %42 = vector.load %arg3[%c0_19, %c0_20] : memref<8x128xf32, #tpu.memory_space<vmem>>, vector<8x128xf32>
    tpu.vector_store %arg3[%c0_19, %c0_20], %41 {strides = array<i32>} : memref<8x128xf32, #tpu.memory_space<vmem>>, vector<8x128xf32>,
    return
  }
  func.func @transform_0(%arg0: i32) -> (i32, i32) {
    %c0_i32 = arith.constant 0 : i32
    %c0_i32_0 = arith.constant 0 : i32
    return %arg0, %c0_i32 : i32, i32
  }
  func.func @transform_1(%arg0: i32) -> (i32, i32) {
    %c0_i32 = arith.constant 0 : i32
    %c0_i32_0 = arith.constant 0 : i32
    %c0_i32_1 = arith.constant 0 : i32
    return %c0_i32, %c0_i32_0 : i32, i32
  }
  func.func @transform_2(%arg0: i32) -> (i32, i32) {
    %c0_i32 = arith.constant 0 : i32
    %c0_i32_0 = arith.constant 0 : i32
    return %arg0, %c0_i32 : i32, i32
  }
}

</mosaic_0001>

<bundles_post_ra>
// kernel: tpu_custom_call.1
= control target key start
LH: loop header
LB: loop body
LE: loop exit
PB: predicated region body
PF: predicated region fallthrough
CT: control target
= control target key end

     0   :  { %7 = vsyncpa [#allocation3], 0  ;;  %s653_s0 = inlined_call_operand.hbm [shape: f32[8,13], index: 0, kind: input, shape index: {}]   ;;  %s654_s1 = inlined_call_operand.hbm [shape: f32[144,128], index: 1, kind: input, shape index: {}]   ;;  %s655_s2 = inlined_call_operand.hbm [shape: f32[8,128], index: 2, kind: output, shape index: {}]  }
   0x1   :  { %8 = vsyncpa [#allocation6], 0 }
   0x2   :  { %9 = vsyncpa [#allocation4], 0  ;;  %s579_s9 = smov [#allocation2]   ;;  %s580_s11 = smov [#allocation5]  }
   0x3   :  { %s16_s10 = sshll.u32 %s579_s9, 4  ;;  %s25_s12 = sshll.u32 %s580_s11, 4  ;;  %s17_s10 = int_to_ptr.vmem [resolvable:$true] %s16_s10  ;;  %s603_s12 = int_to_ptr.vmem [resolvable:$true] %s25_s12 }
   0x4   :  { %s507_s15 = scalar_lea.hbm %s653_s0, 128 }
   0x5   :  { %p508_p0 = scmp.ne.s32.totalorder %s653_s0, %s507_s15  ;;  %p511_p1 = scmp.lt.u32.totalorder %s507_s15, %s653_s0 }
   0x7   :  { %p513_p2 = pnand %p511_p1, %p508_p0 }
   0x9   :  { %516 = shalt.err (!%p513_p2)
}
   0xa   :  { %s517_s20 = scalar_lea.vmem %s17_s10, 128  ;;  %p522_p4 = scmp.lt.s32.totalorder %s17_s10, %s17_s10 }
   0xb   :  { %p518_p3 = scmp.ne.s32.totalorder %s17_s10, %s517_s20  ;;  %p523_p5 = scmp.lt.s32.totalorder %s517_s20, %s517_s20 }
   0xd   :  { %p524_p6 = por %p523_p5, %p522_p4 }
   0xf   :  { %p525_p7 = pnand %p524_p6, %p518_p3 }
  0x11   :  { %528 = shalt.err (!%p525_p7)
}
  0x12   :  { %19 = dma.hbm_to_vmem [thread:$0]  %s653_s0, 128, %s17_s10, [#allocation3]  }
  0x13   :  { %s529_s25 = scalar_lea.hbm %s654_s1, 2304 }
  0x14   :  { %p530_p8 = scmp.ne.s32.totalorder %s654_s1, %s529_s25  ;;  %p533_p9 = scmp.lt.u32.totalorder %s529_s25, %s654_s1 }
  0x16   :  { %p535_p10 = pnand %p533_p9, %p530_p8 }
  0x18   :  { %538 = shalt.err (!%p535_p10)
}
  0x19   :  { %s539_s30 = scalar_lea.vmem %s603_s12, 2304  ;;  %p544_p12 = scmp.lt.s32.totalorder %s603_s12, %s603_s12 }
  0x1a   :  { %p540_p11 = scmp.ne.s32.totalorder %s603_s12, %s539_s30  ;;  %p545_p13 = scmp.lt.s32.totalorder %s539_s30, %s539_s30 }
  0x1c   :  { %p546_p0 = por %p545_p13, %p544_p12 }
  0x1e   :  { %p547_p1 = pnand %p546_p0, %p540_p11 }
  0x20   :  { %550 = shalt.err (!%p547_p1)
}
  0x21   :  { %s581_s0 = smov 128   ;;  %s582_s3 = smov 8  }
  0x22   :  { %31 = dma.hbm_to_vmem [thread:$0]  %s654_s1, 2304, %s603_s12, [#allocation6], %s581_s0, %s581_s0, %s582_s3  }
  0x23   :  { %573 = dma.done.wait [#allocation3], 128  }
  0x24   :  { %574 = vsyncadd [#allocation3], 4294967168 }
  0x25   :  { %575 = dma.done.wait [#allocation6], 2304  }
  0x26   :  { %576 = vsyncadd [#allocation6], 4294964992  ;;  %v583_v0 = vmov 0.0|0.0   ;;  %vm584_vm0 = vmmov 0   ;;  %v585_v1 = vmov 0.0   ;;  %vm65_vm1 = vcmask 1044480  }
  0x27   :  { %472 = vmatprep.subr.bf16.mxu0 %v583_v0  ;;  %476 = vmatprep.subr.bf16.mxu1 %v583_v0  ;;  %v39_v2 = vld [vmem:[#allocation5] sm:$0xff]  ;;  %v40_v3 = vld [vmem:[#allocation5 + $0x8] sm:$0x1f]  ;;  %vm586_vm2 = vmmov 1   ;;  %v41_v5 = vld [vmem:[#allocation5 + $0x10] sm:$0xff]  ;;  %vm61_vm4 = vcmask 105472   ;;  %v374_v39 = vlaneseq }
  0x28   :  { %436 = vmatprep.mubr.msk.f32.mxu0 %vm584_vm0, %v585_v1  ;;  %447 = vmatprep.mubr.msk.f32.mxu1 %vm584_vm0, %v585_v1  ;;  %vm474_vm3 = vmpackc.low %vm65_vm1, %vm586_vm2  ;;  %v473_v4 = vpack.c.bf16 %v40_v3, %v39_v2  ;;  %v42_v6 = vld [vmem:[#allocation5 + $0x18] sm:$0xff]  ;;  %v43_v9 = vld [vmem:[#allocation5 + $0x20] sm:$0xff]  ;;  %vm144_vm5 = vcmask 261120   ;;  %s587_s1 = smov [#allocation7]  }
  0x29   :  { %v477_v7 = vpack.c.bf16 %v42_v6, %v41_v5  ;;  %v38_v8 = vld [vmem:[#allocation2] sm:$0xff]  ;;  %v44_v10 = vld [vmem:[#allocation5 + $0x28] sm:$0xff]  ;;  %v45_v12 = vld [vmem:[#allocation5 + $0x30] sm:$0xff]  ;;  %v375_v40 = vand.u32 127, %v374_v39  ;;  %s395_s6 = sshll.u32 %s587_s1, 4  ;;  %s396_s6 = int_to_ptr.vmem [resolvable:$true] %s395_s6 }
  0x2a   :  { %475 = vmatpush3.bf16.msk.msra.mxu0 %vm474_vm3, %v473_v4  ;;  %v480_v11 = vpack.c.bf16 %v44_v10, %v43_v9  ;;  %v46_v13 = vld [vmem:[#allocation5 + $0x38] sm:$0xff]  ;;  %v405_v15 = vld [vmem:[#allocation5 + $0x70] ss:$0 sm:$0xff]  ;;  %v47_v20 = vld [vmem:[#allocation5 + $0x40] sm:$0xff]  ;;  %s551_s7 = scalar_lea.vmem %s396_s6, 128  ;;  %p556_p3 = scmp.lt.s32.totalorder %s396_s6, %s396_s6 }
  0x2b   :  { %478 = vmatpush3.bf16.msra.mxu1 %v477_v7  ;;  %482 = vmatprep.subr.bf16.mxu0 %v583_v0  ;;  %v483_v14 = vpack.c.bf16 %v46_v13, %v45_v12  ;;  %v48_v21 = vld [vmem:[#allocation5 + $0x48] sm:$0xff]  ;;  %v49_v23 = vld [vmem:[#allocation5 + $0x50] sm:$0xff]  ;;  %v50_v24 = vld [vmem:[#allocation5 + $0x58] sm:$0xff]  ;;  %vm376_vm6 = vcmp.lt.s32.totalorder %v375_v40, 3  ;;  %p552_p2 = scmp.ne.s32.totalorder %s396_s6, %s551_s7  ;;  %p557_p4 = scmp.lt.s32.totalorder %s551_s7, %s551_s7 }
  0x2c   :  { %479 = vmatprep.subr.bf16.mxu1 %v583_v0  ;;  %v486_v22 = vpack.c.bf16 %v48_v21, %v47_v20  ;;  %v489_v25 = vpack.c.bf16 %v50_v24, %v49_v23  ;;  %v408_v26 = vld [vmem:[#allocation5 + $0x78] ss:$0 sm:$0xff]  ;;  %v51_v31 = vld [vmem:[#allocation5 + $0x60] sm:$0xff]  ;;  %v52_v32 = vld [vmem:[#allocation5 + $0x68] sm:$0xff] }
  0x2d   :  { %437 = vmatmul.mubr.msk.f32.vlgmr.msra.gmra.mrb[0].mxu0 %vm61_vm4, %v38_v8  ;;  %v492_v33 = vpack.c.bf16 %v52_v32, %v51_v31  ;;  %v410_v34 = vld [vmem:[#allocation5 + $0x80] ss:$0 sm:$0xff]  ;;  %v412_v41 = vld [vmem:[#allocation5 + $0x88] ss:$0 sm:$0xff]  ;;  %p558_p5 = por %p557_p4, %p556_p3 }
  0x2e   :  { %458 = vmatprep.mubr.msk.f32.mxu0 %vm584_vm0, %v585_v1  ;;  %484 = vmatpush3.bf16.msra.mxu0 %v483_v14 }
  0x2f   :  { %481 = vmatpush3.bf16.msra.mxu1 %v480_v11  ;;  %485 = vmatprep.subr.bf16.mxu0 %v583_v0  ;;  %p559_p6 = pnand %p558_p5, %p552_p2 }
  0x30   :  { %488 = vmatprep.subr.bf16.mxu1 %v583_v0 }
  0x32   :  { %487 = vmatpush3.bf16.msra.mxu0 %v486_v22 }
 0x100   :  { %v135_v16 = vpop.f32.mrb[0].mxu0 }
 0x101   :  { %v136_v17 = vadd.f32 %v405_v15, %v135_v16  ;;  %v438_v18 = vpop.f32.mrb[1].mxu0 }
 0x103   :  { %v139_v19 = vmax.f32 %v136_v17, 0.0 }
 0x105   :  { %448 = vmatmul.mubr.msk.f32.vlgmr.msra.gmra.mrb[0].mxu1 %vm144_vm5, %v139_v19 }
 0x106   :  { %469 = vmatprep.mubr.msk.f32.mxu1 %vm584_vm0, %v585_v1  ;;  %490 = vmatpush3.bf16.msra.mxu1 %v489_v25 }
 0x107   :  { %491 = vmatprep.subr.bf16.mxu1 %v583_v0 }
 0x10a   :  { %493 = vmatpush3.bf16.msra.mxu1 %v492_v33 }
 0x1d8   :  { %v214_v27 = vpop.f32.mrb[0].mxu1 }
 0x1d9   :  { %v215_v28 = vadd.f32 %v408_v26, %v214_v27  ;;  %v449_v29 = vpop.f32.mrb[1].mxu1 }
 0x1db   :  { %v218_v30 = vmax.f32 %v215_v28, 0.0 }
 0x1dd   :  { %459 = vmatmul.mubr.msk.f32.vlgmr.msra.gmra.mrb[2].mxu0 %vm144_vm5, %v218_v30 }
 0x2b0   :  { %v292_v35 = vpop.f32.mrb[2].mxu0 }
 0x2b1   :  { %v293_v36 = vadd.f32 %v410_v34, %v292_v35  ;;  %v460_v37 = vpop.f32.mrb[3].mxu0 }
 0x2b3   :  { %v296_v38 = vmax.f32 %v293_v36, 0.0 }
 0x2b5   :  { %470 = vmatmul.mubr.msk.f32.vlgmr.msra.gmra.mrb[2].mxu1 %vm144_vm5, %v296_v38 }
 0x388   :  { %v370_v42 = vpop.f32.mrb[2].mxu1 }
 0x389   :  { %v371_v43 = vadd.f32 %v412_v41, %v370_v42  ;;  %v471_v44 = vpop.f32.mrb[3].mxu1 }
 0x38b   :  { %v377_v45 = vsel %vm376_vm6, %v371_v43, -1e+30 }
 0x38c   :  { %378 = vmax.xlane.f32.xlu0 %v377_v45 }
 0x419   :  { %v379_v46 = vpop.xlane.xlu0 %378 }
 0x41a   :  { %v380_v47 = vsub.f32 %v377_v45, %v379_v46 }
 0x41c   :  { %v381_v48 = vmul.f32 1.442695, %v380_v47 }
 0x41e   :  { %503 = vpow2.f32 %v381_v48 }
 0x428   :  { %v504_v49 = vpop.eup %503 }
 0x429   :  { %383 = vadd.xlane.f32.xlu0 %v504_v49 }
 0x4b6   :  { %v384_v50 = vpop.xlane.xlu0 %383 }
 0x4b7   :  { %505 = vlog2.f32 %v384_v50 }
 0x4c1   :  { %v506_v51 = vpop.eup %505 }
 0x4c2   :  { %v386_v52 = vmul.f32 0.6931472, %v506_v51 }
 0x4c4   :  { %v387_v53 = vsub.f32 %v380_v47, %v386_v52 }
 0x4c6   :  { %388 = vst [vmem:[#allocation7] sm:$0xff] %v387_v53 }
 0x4c7   :  { %562 = shalt.err (!%p559_p6)
}
 0x4c8   :  { %s563_s10 = scalar_lea.hbm %s655_s2, 128 }
 0x4c9   :  { %p564_p7 = scmp.ne.s32.totalorder %s655_s2, %s563_s10  ;;  %p567_p8 = scmp.lt.u32.totalorder %s563_s10, %s655_s2 }
 0x4cb   :  { %p569_p9 = pnand %p567_p8, %p564_p7 }
 0x4cd   :  { %572 = shalt.err (!%p569_p9)
}
 0x4ce   :  { %398 = dma.vmem_to_hbm [thread:$0]  %s396_s6, 128, %s655_s2, [#allocation4]  }
 0x4cf   :  { %577 = dma.done.wait [#allocation4], 128  }
 0x4d0   :  { %578 = vsyncadd [#allocation4], 4294967168 }
 0x4d1   :  { %402 = vsyncpa [#allocation3], 1 }
 0x4d2   :  { %403 = vsyncpa [#allocation6], 1 }
 0x4d3   :  { %404 = vsyncpa [#allocation4], 1 }

</bundles_post_ra>
